<compile_context>
chip_gen: v7x
topology: tpu7x:2x2x1
jax: 0.10.0
libtpu: 0.0.40
codegen_flags: <defaults>
</compile_context>

<pallas_src>
import jax
import jax.numpy as jnp
from jax.experimental import pallas as pl
from jax.experimental.pallas import tpu as pltpu

_LANE = 128


def _round_up(n, m):
    return ((n + m - 1) // m) * m


def mlp_kernel(x_ref, w1_ref, b1_ref, w2_ref, b2_ref, o_ref):
    # fc1: x @ W1 (+ b1). x arrives f32 straight from HBM; the bf16 cast is a VPU
    # op fully hidden under the MXU, so no padded/cast copy of x is materialized.
    x = x_ref[...].astype(jnp.bfloat16)
    h = jnp.dot(x, w1_ref[...], preferred_element_type=jnp.float32)
    h = h + b1_ref[...]                                   # [1, H_pad] broadcast
    # sigmoid in f32: exp and approx reciprocal both run on the EUP slot.
    # TODO(synk): on v6e/v7x a bf16 exp ~doubles EUP throughput if the sigmoid ever
    # becomes the binding slot at large batch; kept f32 here for accuracy/parity.
    h = pl.reciprocal(1.0 + jnp.exp(-h), approx=True)
    # fc5: h @ W2 (+ b2); activation cast to bf16 only for the MXU, f32 accumulate.
    y = jnp.dot(h.astype(jnp.bfloat16), w2_ref[...],
                preferred_element_type=jnp.float32)
    o_ref[...] = (y + b2_ref[...]).astype(o_ref.dtype)


def prepare_params(w1_t, b1, w2_t, b2):
    """One-time (init-time) packing of fc1/fc5 parameters for the kernel.

    w1_t: [in, h], b1: [h], w2_t: [h, out], b2: [out]  (transposed torch layout).
    The hidden dim is zero-padded lane-dense (128; 256 when h >= 256 so the
    256-wide v6e/v7x MXUs stay full). Padded hidden lanes see sigmoid(0)=0.5 but
    the matching zero rows of W2 cancel them, so the result is exact.
    """
    in_size, h_size = w1_t.shape
    h2_size, out_size = w2_t.shape
    assert h2_size == h_size, "forward requires hidden_dim1 == hidden_dim2"

    h_mult = 256 if h_size >= 256 else _LANE
    h_p = _round_up(h_size, h_mult)

    f32, bf16 = jnp.float32, jnp.bfloat16
    w1_p = jnp.zeros((in_size, h_p), f32).at[:, :h_size].set(w1_t).astype(bf16)
    w2_p = jnp.zeros((h_p, out_size), f32).at[:h_size, :].set(w2_t).astype(bf16)
    b1_p = jnp.zeros((1, h_p), f32).at[:, :h_size].set(b1.reshape(1, -1))
    b2_p = jnp.asarray(b2, f32).reshape(1, out_size)
    return (w1_p, b1_p, w2_p, b2_p)


def _batch_tiling(B, tile_b):
    # Near-equal multiple-of-8 tiles: padding work on the final partial tile stays
    # small, and large batches get >= 2 grid steps so "parallel" can use both
    # TensorCores on v7x.
    n_tiles = pl.cdiv(B, tile_b)
    if B >= 256 and n_tiles < 2:
        n_tiles = 2
    tb = _round_up(pl.cdiv(B, n_tiles), 8)
    return tb, pl.cdiv(B, tb)


def torch_model_pallas(x, params, *, tile_b=1024):
    """x: [B, in_size] f32 (unpadded); params from prepare_params()."""
    w1_p, b1_p, w2_p, b2_p = params
    B, in_size = x.shape
    in_w1, h_p = w1_p.shape
    out_size = w2_p.shape[1]
    assert in_w1 == in_size

    tb, n_steps = _batch_tiling(B, tile_b)
    grid = (n_steps,)

    # VMEM budget: double-buffered x/out tiles + resident weights + f32
    # intermediates, with margin. Set explicitly so scaled-up shapes neither trip
    # the 32 MiB default scoped limit nor blow v7x's 64 MiB physical VMEM.
    weights_bytes = (w1_p.size + w2_p.size) * 2 + (b1_p.size + b2_p.size) * 4
    tile_bytes = tb * (in_size + out_size) * 4 * 2 + tb * h_p * 4 * 3
    vmem_limit = int(min(100 * 2**20, max(32 * 2**20, 2 * (weights_bytes + tile_bytes))))

    cost = pl.CostEstimate(
        flops=int(2 * B * (in_size * h_p + h_p * out_size)),
        transcendentals=int(B * h_p),
        bytes_accessed=int(x.size * 4 + weights_bytes + B * out_size * 4),
    )

    def _call(single_buffer_weights):
        const_kw = {"pipeline_mode": pl.Buffered(1)} if single_buffer_weights else {}
        in_specs = [
            pl.BlockSpec((tb, in_size), lambda i: (i, 0)),               # x: pipelined batch tiles
            pl.BlockSpec((in_size, h_p), lambda i: (0, 0), **const_kw),  # W1: VMEM-resident
            pl.BlockSpec((1, h_p), lambda i: (0, 0), **const_kw),        # b1: VMEM-resident
            pl.BlockSpec((h_p, out_size), lambda i: (0, 0), **const_kw), # W2: VMEM-resident
            pl.BlockSpec((1, out_size), lambda i: (0, 0), **const_kw),   # b2: VMEM-resident
        ]
        return pl.pallas_call(
            mlp_kernel,
            out_shape=jax.ShapeDtypeStruct((B, out_size), x.dtype),
            grid=grid,
            in_specs=in_specs,
            out_specs=pl.BlockSpec((tb, out_size), lambda i: (i, 0)),
            compiler_params=pltpu.CompilerParams(
                dimension_semantics=("parallel",),   # v7x: shard batch tiles over 2 TCs
                vmem_limit_bytes=vmem_limit,
            ),
            cost_estimate=cost,
        )(x, w1_p, b1_p, w2_p, b2_p)

    try:
        # Single-buffer the constant (resident) weight/bias blocks.
        return _call(True)
    except Exception:
        # Fallback for jax versions without BlockSpec pipeline_mode / Buffered(1).
        return _call(False)


if __name__ == "__main__":
    # Small shapes consistent with the module's forward pass.
    batch = 8
    input_size = 16
    hidden_dim1 = 32   # must equal hidden_dim2 for forward to be well-defined
    hidden_dim2 = 32
    output_size = 8

    key = jax.random.PRNGKey(0)
    kx, kw1, kb1, kw2, kb2 = jax.random.split(key, 5)

    x = jax.random.normal(kx, (batch, input_size), dtype=jnp.float32)

    # PyTorch Linear stores W as [out, in]; we keep the transposed [in, out] layout.
    w1_t = jax.random.normal(kw1, (input_size, hidden_dim1), dtype=jnp.float32) * 0.1
    b1 = jax.random.normal(kb1, (hidden_dim1,), dtype=jnp.float32) * 0.1
    w2_t = jax.random.normal(kw2, (hidden_dim2, output_size), dtype=jnp.float32) * 0.1
    b2 = jax.random.normal(kb2, (output_size,), dtype=jnp.float32) * 0.1

    # One-time parameter packing (hoisted out of the per-call path).
    params = prepare_params(w1_t, b1, w2_t, b2)

    out = torch_model_pallas(x, params)
    out = jax.block_until_ready(out)

    # Pure-JAX f32 reference of the same math (bf16 MXU operands + approx
    # reciprocal => relaxed tolerance).
    ref = jax.nn.sigmoid(x @ w1_t + b1) @ w2_t + b2
    assert out.shape == (batch, output_size)
    assert jnp.allclose(out, ref, atol=2e-2, rtol=2e-2), \
        float(jnp.max(jnp.abs(out - ref)))

    print("KERNEL_OK")
</pallas_src>

<mosaic_0001>
module attributes {stable_mosaic.version = 11 : i64} {
  func.func @mlp_kernel(%arg0: i32, %arg1: memref<8x16xf32, #tpu.memory_space<vmem>>, %arg2: memref<16x128xbf16, #tpu.memory_space<vmem>>, %arg3: memref<1x128xf32, #tpu.memory_space<vmem>>, %arg4: memref<128x8xbf16, #tpu.memory_space<vmem>>, %arg5: memref<1x8xf32, #tpu.memory_space<vmem>>, %arg6: memref<8x8xf32, #tpu.memory_space<vmem>>) attributes {dimension_semantics = [#tpu.dimension_semantics<parallel>], iteration_bounds = array<i64: 1>, scalar_prefetch = 0 : i64, scratch_operands = 0 : i64, tpu.core_type = #tpu.core_type<tc>, window_params = [{transform_indices = @transform_0, window_bounds = array<i64: 8, 16>}, {pipeline_mode = #tpu.pipeline_mode<synchronous>, transform_indices = @transform_1, window_bounds = array<i64: 16, 128>}, {pipeline_mode = #tpu.pipeline_mode<synchronous>, transform_indices = @transform_2, window_bounds = array<i64: 1, 128>}, {pipeline_mode = #tpu.pipeline_mode<synchronous>, transform_indices = @transform_3, window_bounds = array<i64: 128, 8>}, {pipeline_mode = #tpu.pipeline_mode<synchronous>, transform_indices = @transform_4, window_bounds = array<i64: 1, 8>}, {transform_indices = @transform_5, window_bounds = array<i64: 8, 8>}]} {
    %c0 = arith.constant 0 : index
    %c0_0 = arith.constant 0 : index
    %0 = vector.load %arg1[%c0, %c0_0] : memref<8x16xf32, #tpu.memory_space<vmem>>, vector<8x16xf32>
    %1 = arith.truncf %0 : vector<8x16xf32> to vector<8x16xbf16>
    %c0_1 = arith.constant 0 : index
    %c0_2 = arith.constant 0 : index
    %2 = vector.load %arg2[%c0_1, %c0_2] : memref<16x128xbf16, #tpu.memory_space<vmem>>, vector<16x128xbf16>
    %cst = arith.constant dense<0.000000e+00> : vector<8x128xf32>
    %3 = tpu.matmul %1, %2, %cst {dimension_numbers = #tpu.dot_dimension_numbers<[1], [0], [0], [1], [0, 0, 1, 1], [], []>} : vector<8x16xbf16>, vector<16x128xbf16>, vector<8x128xf32> -> vector<8x128xf32>
    %c0_3 = arith.constant 0 : index
    %c0_4 = arith.constant 0 : index
    %4 = vector.load %arg3[%c0_3, %c0_4] : memref<1x128xf32, #tpu.memory_space<vmem>>, vector<1x128xf32>
    %5 = vector.broadcast %4 : vector<1x128xf32> to vector<8x128xf32>
    %6 = arith.addf %3, %5 : vector<8x128xf32>
    %cst_5 = arith.constant 0.000000e+00 : f32
    %7 = vector.broadcast %cst_5 : f32 to vector<8x128xf32>
    %8 = arith.subf %7, %6 : vector<8x128xf32>
    %9 = math.exp %8 : vector<8x128xf32>
    %cst_6 = arith.constant 1.000000e+00 : f32
    %10 = vector.broadcast %cst_6 : f32 to vector<8x128xf32>
    %11 = arith.addf %10, %9 : vector<8x128xf32>
    %12 = tpu.reciprocal %11 {approx = true} : vector<8x128xf32> -> vector<8x128xf32>
    %13 = arith.truncf %12 : vector<8x128xf32> to vector<8x128xbf16>
    %c0_7 = arith.constant 0 : index
    %c0_8 = arith.constant 0 : index
    %14 = vector.load %arg4[%c0_7, %c0_8] : memref<128x8xbf16, #tpu.memory_space<vmem>>, vector<128x8xbf16>
    %cst_9 = arith.constant dense<0.000000e+00> : vector<8x8xf32>
    %15 = tpu.matmul %13, %14, %cst_9 {dimension_numbers = #tpu.dot_dimension_numbers<[1], [0], [0], [1], [0, 0, 1, 1], [], []>} : vector<8x128xbf16>, vector<128x8xbf16>, vector<8x8xf32> -> vector<8x8xf32>
    %c0_10 = arith.constant 0 : index
    %c0_11 = arith.constant 0 : index
    %16 = vector.load %arg5[%c0_10, %c0_11] : memref<1x8xf32, #tpu.memory_space<vmem>>, vector<1x8xf32>
    %17 = vector.broadcast %16 : vector<1x8xf32> to vector<8x8xf32>
    %18 = arith.addf %15, %17 : vector<8x8xf32>
    %c0_12 = arith.constant 0 : index
    %c0_13 = arith.constant 0 : index
    %19 = vector.load %arg6[%c0_12, %c0_13] : memref<8x8xf32, #tpu.memory_space<vmem>>, vector<8x8xf32>
    tpu.vector_store %arg6[%c0_12, %c0_13], %18 {strides = array<i32>} : memref<8x8xf32, #tpu.memory_space<vmem>>, vector<8x8xf32>,
    return
  }
  func.func @transform_0(%arg0: i32) -> (i32, i32) {
    %c0_i32 = arith.constant 0 : i32
    %c0_i32_0 = arith.constant 0 : i32
    return %arg0, %c0_i32 : i32, i32
  }
  func.func @transform_1(%arg0: i32) -> (i32, i32) {
    %c0_i32 = arith.constant 0 : i32
    %c0_i32_0 = arith.constant 0 : i32
    %c0_i32_1 = arith.constant 0 : i32
    return %c0_i32, %c0_i32_0 : i32, i32
  }
  func.func @transform_2(%arg0: i32) -> (i32, i32) {
    %c0_i32 = arith.constant 0 : i32
    %c0_i32_0 = arith.constant 0 : i32
    %c0_i32_1 = arith.constant 0 : i32
    return %c0_i32, %c0_i32_0 : i32, i32
  }
  func.func @transform_3(%arg0: i32) -> (i32, i32) {
    %c0_i32 = arith.constant 0 : i32
    %c0_i32_0 = arith.constant 0 : i32
    %c0_i32_1 = arith.constant 0 : i32
    return %c0_i32, %c0_i32_0 : i32, i32
  }
  func.func @transform_4(%arg0: i32) -> (i32, i32) {
    %c0_i32 = arith.constant 0 : i32
    %c0_i32_0 = arith.constant 0 : i32
    %c0_i32_1 = arith.constant 0 : i32
    return %c0_i32, %c0_i32_0 : i32, i32
  }
  func.func @transform_5(%arg0: i32) -> (i32, i32) {
    %c0_i32 = arith.constant 0 : i32
    %c0_i32_0 = arith.constant 0 : i32
    return %arg0, %c0_i32 : i32, i32
  }
}

module attributes {stable_mosaic.version = 11 : i64} {
  func.func @mlp_kernel(%arg0: i32, %arg1: memref<8x16xf32, #tpu.memory_space<vmem>>, %arg2: memref<16x128xbf16, #tpu.memory_space<vmem>>, %arg3: memref<1x128xf32, #tpu.memory_space<vmem>>, %arg4: memref<128x8xbf16, #tpu.memory_space<vmem>>, %arg5: memref<1x8xf32, #tpu.memory_space<vmem>>, %arg6: memref<8x8xf32, #tpu.memory_space<vmem>>) attributes {dimension_semantics = [#tpu.dimension_semantics<parallel>], iteration_bounds = array<i64: 1>, scalar_prefetch = 0 : i64, scratch_operands = 0 : i64, tpu.core_type = #tpu.core_type<tc>, window_params = [{transform_indices = @transform_0, window_bounds = array<i64: 8, 16>}, {pipeline_mode = #tpu.pipeline_mode<synchronous>, transform_indices = @transform_1, window_bounds = array<i64: 16, 128>}, {pipeline_mode = #tpu.pipeline_mode<synchronous>, transform_indices = @transform_2, window_bounds = array<i64: 1, 128>}, {pipeline_mode = #tpu.pipeline_mode<synchronous>, transform_indices = @transform_3, window_bounds = array<i64: 128, 8>}, {pipeline_mode = #tpu.pipeline_mode<synchronous>, transform_indices = @transform_4, window_bounds = array<i64: 1, 8>}, {transform_indices = @transform_5, window_bounds = array<i64: 8, 8>}]} {
    %c0 = arith.constant 0 : index
    %c0_0 = arith.constant 0 : index
    %0 = vector.load %arg1[%c0, %c0_0] : memref<8x16xf32, #tpu.memory_space<vmem>>, vector<8x16xf32>
    %1 = arith.truncf %0 : vector<8x16xf32> to vector<8x16xbf16>
    %c0_1 = arith.constant 0 : index
    %c0_2 = arith.constant 0 : index
    %2 = vector.load %arg2[%c0_1, %c0_2] : memref<16x128xbf16, #tpu.memory_space<vmem>>, vector<16x128xbf16>
    %cst = arith.constant dense<0.000000e+00> : vector<8x128xf32>
    %3 = tpu.matmul %1, %2, %cst {dimension_numbers = #tpu.dot_dimension_numbers<[1], [0], [0], [1], [0, 0, 1, 1], [], []>} : vector<8x16xbf16>, vector<16x128xbf16>, vector<8x128xf32> -> vector<8x128xf32>
    %c0_3 = arith.constant 0 : index
    %c0_4 = arith.constant 0 : index
    %4 = vector.load %arg3[%c0_3, %c0_4] : memref<1x128xf32, #tpu.memory_space<vmem>>, vector<1x128xf32>
    %5 = vector.broadcast %4 : vector<1x128xf32> to vector<8x128xf32>
    %6 = arith.addf %3, %5 : vector<8x128xf32>
    %cst_5 = arith.constant 0.000000e+00 : f32
    %7 = vector.broadcast %cst_5 : f32 to vector<8x128xf32>
    %8 = arith.subf %7, %6 : vector<8x128xf32>
    %9 = math.exp %8 : vector<8x128xf32>
    %cst_6 = arith.constant 1.000000e+00 : f32
    %10 = vector.broadcast %cst_6 : f32 to vector<8x128xf32>
    %11 = arith.addf %10, %9 : vector<8x128xf32>
    %12 = tpu.reciprocal %11 {approx = true} : vector<8x128xf32> -> vector<8x128xf32>
    %13 = arith.truncf %12 : vector<8x128xf32> to vector<8x128xbf16>
    %c0_7 = arith.constant 0 : index
    %c0_8 = arith.constant 0 : index
    %14 = vector.load %arg4[%c0_7, %c0_8] : memref<128x8xbf16, #tpu.memory_space<vmem>>, vector<128x8xbf16>
    %cst_9 = arith.constant dense<0.000000e+00> : vector<8x8xf32>
    %15 = tpu.matmul %13, %14, %cst_9 {dimension_numbers = #tpu.dot_dimension_numbers<[1], [0], [0], [1], [0, 0, 1, 1], [], []>} : vector<8x128xbf16>, vector<128x8xbf16>, vector<8x8xf32> -> vector<8x8xf32>
    %c0_10 = arith.constant 0 : index
    %c0_11 = arith.constant 0 : index
    %16 = vector.load %arg5[%c0_10, %c0_11] : memref<1x8xf32, #tpu.memory_space<vmem>>, vector<1x8xf32>
    %17 = vector.broadcast %16 : vector<1x8xf32> to vector<8x8xf32>
    %18 = arith.addf %15, %17 : vector<8x8xf32>
    %c0_12 = arith.constant 0 : index
    %c0_13 = arith.constant 0 : index
    %19 = vector.load %arg6[%c0_12, %c0_13] : memref<8x8xf32, #tpu.memory_space<vmem>>, vector<8x8xf32>
    tpu.vector_store %arg6[%c0_12, %c0_13], %18 {strides = array<i32>} : memref<8x8xf32, #tpu.memory_space<vmem>>, vector<8x8xf32>,
    return
  }
  func.func @transform_0(%arg0: i32) -> (i32, i32) {
    %c0_i32 = arith.constant 0 : i32
    %c0_i32_0 = arith.constant 0 : i32
    return %arg0, %c0_i32 : i32, i32
  }
  func.func @transform_1(%arg0: i32) -> (i32, i32) {
    %c0_i32 = arith.constant 0 : i32
    %c0_i32_0 = arith.constant 0 : i32
    %c0_i32_1 = arith.constant 0 : i32
    return %c0_i32, %c0_i32_0 : i32, i32
  }
  func.func @transform_2(%arg0: i32) -> (i32, i32) {
    %c0_i32 = arith.constant 0 : i32
    %c0_i32_0 = arith.constant 0 : i32
    %c0_i32_1 = arith.constant 0 : i32
    return %c0_i32, %c0_i32_0 : i32, i32
  }
  func.func @transform_3(%arg0: i32) -> (i32, i32) {
    %c0_i32 = arith.constant 0 : i32
    %c0_i32_0 = arith.constant 0 : i32
    %c0_i32_1 = arith.constant 0 : i32
    return %c0_i32, %c0_i32_0 : i32, i32
  }
  func.func @transform_4(%arg0: i32) -> (i32, i32) {
    %c0_i32 = arith.constant 0 : i32
    %c0_i32_0 = arith.constant 0 : i32
    %c0_i32_1 = arith.constant 0 : i32
    return %c0_i32, %c0_i32_0 : i32, i32
  }
  func.func @transform_5(%arg0: i32) -> (i32, i32) {
    %c0_i32 = arith.constant 0 : i32
    %c0_i32_0 = arith.constant 0 : i32
    return %arg0, %c0_i32 : i32, i32
  }
}

</mosaic_0001>

<bundles_post_ra>
// kernel: tpu_custom_call.1
= control target key start
LH: loop header
LB: loop body
LE: loop exit
PB: predicated region body
PF: predicated region fallthrough
CT: control target
= control target key end

     0   :  { %v305_v1 = vmov 0.0   ;;  %vm39_vm0 = vcmask 130048   ;;  %vm306_vm1 = vmmov 0   ;;  %s386_s0 = inlined_call_operand.vmem [shape: f32[8,16], index: 0, kind: input, shape index: {}]   ;;  %s387_s1 = inlined_call_operand.vmem [shape: bf16[16,128], index: 1, kind: input, shape index: {}]   ;;  %s388_s2 = inlined_call_operand.vmem [shape: f32[1,128], index: 2, kind: input, shape index: {}]   ;;  %s389_s3 = inlined_call_operand.vmem [shape: bf16[128,8], index: 3, kind: input, shape index: {}]   ;;  %s390_s4 = inlined_call_operand.vmem [shape: f32[1,8], index: 4, kind: input, shape index: {}]   ;;  %s391_s5 = inlined_call_operand.hbm [shape: f32[8,8], index: 5, kind: output, shape index: {}]  }
   0x1   :  { %v268_v0 = vld [vmem:[%s387_s1] sm:$0xff]   ;;  %239 = vmatprep.subr.bf16.mxu0 %v305_v1  ;;  %245 = vmatprep.subr.bf16.mxu1 %v305_v1 }
   0x2   :  { %v22_v2 = vld [vmem:[%s386_s0] sm:$0xff]  ;;  %240 = vmatpush3.bf16.msra.mxu0 %v268_v0  ;;  %241 = vmatprep.mubr.msk.bf16.mxu0 %vm306_vm1, %v305_v1 }
   0x3   :  { %v23_v3 = vpack.c.bf16 %v22_v2, %v22_v2  ;;  %261 = vmatprep.mubr.msk.bf16.mxu1 %vm306_vm1, %v305_v1 }
   0x5   :  { %242 = vmatmul.mubr.msk.bf16.vlgmr.msra.gmra.mrb[0].mxu0 %vm39_vm0, %v23_v3 }
   0x6   :  { %10 = vsyncpa [#allocation3], 0  ;;  %v269_v4 = vld [vmem:[%s389_s3] sm:$0xff]   ;;  %v270_v5 = vld [vmem:[%s389_s3 + $0x8] sm:$0xff]   ;;  %s307_s14 = smov [#allocation2]   ;;  %vm200_vm2 = vcmask 64512  }
   0x7   :  { %246 = vmatpush3.bf16.msra.mxu1 %v269_v4  ;;  %v271_v6 = vld [vmem:[%s389_s3 + $0x10] sm:$0xff]   ;;  %v272_v7 = vld [vmem:[%s389_s3 + $0x18] sm:$0xff]   ;;  %v273_v8 = vld [vmem:[%s389_s3 + $0x20] sm:$0xff]  }
   0x8   :  { %247 = vmatprep.subr.bf16.mxu1 %v305_v1  ;;  %v274_v9 = vld [vmem:[%s389_s3 + $0x28] sm:$0xff]   ;;  %v275_v10 = vld [vmem:[%s389_s3 + $0x30] sm:$0xff]   ;;  %v276_v11 = vld [vmem:[%s389_s3 + $0x38] sm:$0xff]  }
   0x9   :  { %v216_v12 = vld [vmem:[%s388_s2] ss:$0 sm:$0xff]  ;;  %s208_s2 = sshll.u32 %s307_s14, 4  ;;  %s209_s2 = int_to_ptr.vmem [resolvable:$true] %s208_s2 }
   0xa   :  { %v219_v24 = vld [vmem:[%s390_s4] ss:$0 sm:$0xff]  ;;  %s281_s15 = scalar_lea.vmem %s209_s2, 128  ;;  %p286_p1 = scmp.lt.s32.totalorder %s209_s2, %s209_s2 }
   0xb   :  { %248 = vmatpush3.bf16.msra.mxu1 %v270_v5  ;;  %p282_p0 = scmp.ne.s32.totalorder %s209_s2, %s281_s15  ;;  %p287_p2 = scmp.lt.s32.totalorder %s281_s15, %s281_s15 }
   0xc   :  { %249 = vmatprep.subr.bf16.mxu1 %v305_v1 }
   0xd   :  { %p288_p3 = por %p287_p2, %p286_p1 }
   0xf   :  { %250 = vmatpush3.bf16.msra.mxu1 %v271_v6  ;;  %p289_p4 = pnand %p288_p3, %p282_p0 }
  0x10   :  { %251 = vmatprep.subr.bf16.mxu1 %v305_v1 }
  0x13   :  { %252 = vmatpush3.bf16.msra.mxu1 %v272_v7 }
  0x14   :  { %253 = vmatprep.subr.bf16.mxu1 %v305_v1 }
  0x17   :  { %254 = vmatpush3.bf16.msra.mxu1 %v273_v8 }
  0x18   :  { %255 = vmatprep.subr.bf16.mxu1 %v305_v1 }
  0x1b   :  { %256 = vmatpush3.bf16.msra.mxu1 %v274_v9 }
  0x1c   :  { %257 = vmatprep.subr.bf16.mxu1 %v305_v1 }
  0x1f   :  { %258 = vmatpush3.bf16.msra.mxu1 %v275_v10 }
  0x20   :  { %259 = vmatprep.subr.bf16.mxu1 %v305_v1 }
  0x23   :  { %260 = vmatpush3.bf16.msra.mxu1 %v276_v11 }
  0xd8   :  { %v77_v13 = vpop.f32.mrb[0].mxu0 }
  0xd9   :  { %v78_v14 = vadd.f32 %v216_v12, %v77_v13  ;;  %v243_v15 = vpop.f32.mrb[1].mxu0 }
  0xda   :  { %v80_v16 = vpop.f32.mrb[2].mxu0 }
  0xdb   :  { %v83_v17 = vsub.f32 0.0, %v78_v14  ;;  %v244_v18 = vpop.f32.mrb[3].mxu0 }
  0xdd   :  { %v84_v19 = vmul.f32 1.442695, %v83_v17 }
  0xdf   :  { %277 = vpow2.f32 %v84_v19 }
  0xe9   :  { %v278_v20 = vpop.eup %277 }
  0xea   :  { %v86_v21 = vadd.f32 1.0, %v278_v20 }
  0xec   :  { %279 = vrcp.f32 %v86_v21 }
  0xf6   :  { %v280_v22 = vpop.eup %279 }
  0xf7   :  { %v88_v23 = vpack.c.bf16 %v280_v22, %v280_v22 }
  0xf9   :  { %262 = vmatmul.mubr.bf16.vlgmr.msra.gmra.mrb[0].mxu1 %v88_v23 }
 0x1cc   :  { %v194_v25 = vpop.f32.mrb[0].mxu1 }
 0x1cd   :  { %v195_v26 = vadd.f32 %v219_v24, %v194_v25  ;;  %v263_v27 = vpop.f32.mrb[1].mxu1 }
 0x1ce   :  { %v197_v28 = vpop.f32.mrb[2].mxu1 }
 0x1cf   :  { %v264_v29 = vpop.f32.mrb[3].mxu1  ;;  %201 = vst.msk [vmem:[#allocation2] sm:$0xff] %vm200_vm2, %v195_v26 }
 0x1d0   :  { %292 = shalt.err (!%p289_p4)
}
 0x1d1   :  { %s293_s4 = scalar_lea.hbm %s391_s5, 128 }
 0x1d2   :  { %p294_p5 = scmp.ne.s32.totalorder %s391_s5, %s293_s4  ;;  %p297_p6 = scmp.lt.u32.totalorder %s293_s4, %s391_s5 }
 0x1d4   :  { %p299_p7 = pnand %p297_p6, %p294_p5 }
 0x1d6   :  { %302 = shalt.err (!%p299_p7)
}
 0x1d7   :  { %211 = dma.vmem_to_hbm [thread:$0]  %s209_s2, 128, %s391_s5, [#allocation3]  }
 0x1d8   :  { %303 = dma.done.wait [#allocation3], 128  }
 0x1d9   :  { %304 = vsyncadd [#allocation3], 4294967168 }
 0x1da   :  { %215 = vsyncpa [#allocation3], 1 }

// kernel: tpu_custom_call.1
= control target key start
LH: loop header
LB: loop body
LE: loop exit
PB: predicated region body
PF: predicated region fallthrough
CT: control target
= control target key end

     0   :  { %v305_v1 = vmov 0.0   ;;  %vm39_vm0 = vcmask 130048   ;;  %vm306_vm1 = vmmov 0   ;;  %s386_s0 = inlined_call_operand.vmem [shape: f32[8,16], index: 0, kind: input, shape index: {}]   ;;  %s387_s1 = inlined_call_operand.vmem [shape: bf16[16,128], index: 1, kind: input, shape index: {}]   ;;  %s388_s2 = inlined_call_operand.vmem [shape: f32[1,128], index: 2, kind: input, shape index: {}]   ;;  %s389_s3 = inlined_call_operand.vmem [shape: bf16[128,8], index: 3, kind: input, shape index: {}]   ;;  %s390_s4 = inlined_call_operand.vmem [shape: f32[1,8], index: 4, kind: input, shape index: {}]   ;;  %s391_s5 = inlined_call_operand.hbm [shape: f32[8,8], index: 5, kind: output, shape index: {}]  }
   0x1   :  { %v268_v0 = vld [vmem:[%s387_s1] sm:$0xff]   ;;  %239 = vmatprep.subr.bf16.mxu0 %v305_v1  ;;  %245 = vmatprep.subr.bf16.mxu1 %v305_v1 }
   0x2   :  { %v22_v2 = vld [vmem:[%s386_s0] sm:$0xff]  ;;  %240 = vmatpush3.bf16.msra.mxu0 %v268_v0  ;;  %241 = vmatprep.mubr.msk.bf16.mxu0 %vm306_vm1, %v305_v1 }
   0x3   :  { %v23_v3 = vpack.c.bf16 %v22_v2, %v22_v2  ;;  %261 = vmatprep.mubr.msk.bf16.mxu1 %vm306_vm1, %v305_v1 }
   0x5   :  { %242 = vmatmul.mubr.msk.bf16.vlgmr.msra.gmra.mrb[0].mxu0 %vm39_vm0, %v23_v3 }
   0x6   :  { %10 = vsyncpa [#allocation3], 0  ;;  %v269_v4 = vld [vmem:[%s389_s3] sm:$0xff]   ;;  %v270_v5 = vld [vmem:[%s389_s3 + $0x8] sm:$0xff]   ;;  %s307_s14 = smov [#allocation2]   ;;  %vm200_vm2 = vcmask 64512  }
   0x7   :  { %246 = vmatpush3.bf16.msra.mxu1 %v269_v4  ;;  %v271_v6 = vld [vmem:[%s389_s3 + $0x10] sm:$0xff]   ;;  %v272_v7 = vld [vmem:[%s389_s3 + $0x18] sm:$0xff]   ;;  %v273_v8 = vld [vmem:[%s389_s3 + $0x20] sm:$0xff]  }
   0x8   :  { %247 = vmatprep.subr.bf16.mxu1 %v305_v1  ;;  %v274_v9 = vld [vmem:[%s389_s3 + $0x28] sm:$0xff]   ;;  %v275_v10 = vld [vmem:[%s389_s3 + $0x30] sm:$0xff]   ;;  %v276_v11 = vld [vmem:[%s389_s3 + $0x38] sm:$0xff]  }
   0x9   :  { %v216_v12 = vld [vmem:[%s388_s2] ss:$0 sm:$0xff]  ;;  %s208_s2 = sshll.u32 %s307_s14, 4  ;;  %s209_s2 = int_to_ptr.vmem [resolvable:$true] %s208_s2 }
   0xa   :  { %v219_v24 = vld [vmem:[%s390_s4] ss:$0 sm:$0xff]  ;;  %s281_s15 = scalar_lea.vmem %s209_s2, 128  ;;  %p286_p1 = scmp.lt.s32.totalorder %s209_s2, %s209_s2 }
   0xb   :  { %248 = vmatpush3.bf16.msra.mxu1 %v270_v5  ;;  %p282_p0 = scmp.ne.s32.totalorder %s209_s2, %s281_s15  ;;  %p287_p2 = scmp.lt.s32.totalorder %s281_s15, %s281_s15 }
   0xc   :  { %249 = vmatprep.subr.bf16.mxu1 %v305_v1 }
   0xd   :  { %p288_p3 = por %p287_p2, %p286_p1 }
   0xf   :  { %250 = vmatpush3.bf16.msra.mxu1 %v271_v6  ;;  %p289_p4 = pnand %p288_p3, %p282_p0 }
  0x10   :  { %251 = vmatprep.subr.bf16.mxu1 %v305_v1 }
  0x13   :  { %252 = vmatpush3.bf16.msra.mxu1 %v272_v7 }
  0x14   :  { %253 = vmatprep.subr.bf16.mxu1 %v305_v1 }
  0x17   :  { %254 = vmatpush3.bf16.msra.mxu1 %v273_v8 }
  0x18   :  { %255 = vmatprep.subr.bf16.mxu1 %v305_v1 }
  0x1b   :  { %256 = vmatpush3.bf16.msra.mxu1 %v274_v9 }
  0x1c   :  { %257 = vmatprep.subr.bf16.mxu1 %v305_v1 }
  0x1f   :  { %258 = vmatpush3.bf16.msra.mxu1 %v275_v10 }
  0x20   :  { %259 = vmatprep.subr.bf16.mxu1 %v305_v1 }
  0x23   :  { %260 = vmatpush3.bf16.msra.mxu1 %v276_v11 }
  0xd8   :  { %v77_v13 = vpop.f32.mrb[0].mxu0 }
  0xd9   :  { %v78_v14 = vadd.f32 %v216_v12, %v77_v13  ;;  %v243_v15 = vpop.f32.mrb[1].mxu0 }
  0xda   :  { %v80_v16 = vpop.f32.mrb[2].mxu0 }
  0xdb   :  { %v83_v17 = vsub.f32 0.0, %v78_v14  ;;  %v244_v18 = vpop.f32.mrb[3].mxu0 }
  0xdd   :  { %v84_v19 = vmul.f32 1.442695, %v83_v17 }
  0xdf   :  { %277 = vpow2.f32 %v84_v19 }
  0xe9   :  { %v278_v20 = vpop.eup %277 }
  0xea   :  { %v86_v21 = vadd.f32 1.0, %v278_v20 }
  0xec   :  { %279 = vrcp.f32 %v86_v21 }
  0xf6   :  { %v280_v22 = vpop.eup %279 }
  0xf7   :  { %v88_v23 = vpack.c.bf16 %v280_v22, %v280_v22 }
  0xf9   :  { %262 = vmatmul.mubr.bf16.vlgmr.msra.gmra.mrb[0].mxu1 %v88_v23 }
 0x1cc   :  { %v194_v25 = vpop.f32.mrb[0].mxu1 }
 0x1cd   :  { %v195_v26 = vadd.f32 %v219_v24, %v194_v25  ;;  %v263_v27 = vpop.f32.mrb[1].mxu1 }
 0x1ce   :  { %v197_v28 = vpop.f32.mrb[2].mxu1 }
 0x1cf   :  { %v264_v29 = vpop.f32.mrb[3].mxu1  ;;  %201 = vst.msk [vmem:[#allocation2] sm:$0xff] %vm200_vm2, %v195_v26 }
 0x1d0   :  { %292 = shalt.err (!%p289_p4)
}
 0x1d1   :  { %s293_s4 = scalar_lea.hbm %s391_s5, 128 }
 0x1d2   :  { %p294_p5 = scmp.ne.s32.totalorder %s391_s5, %s293_s4  ;;  %p297_p6 = scmp.lt.u32.totalorder %s293_s4, %s391_s5 }
 0x1d4   :  { %p299_p7 = pnand %p297_p6, %p294_p5 }
 0x1d6   :  { %302 = shalt.err (!%p299_p7)
}
 0x1d7   :  { %211 = dma.vmem_to_hbm [thread:$0]  %s209_s2, 128, %s391_s5, [#allocation3]  }
 0x1d8   :  { %303 = dma.done.wait [#allocation3], 128  }
 0x1d9   :  { %304 = vsyncadd [#allocation3], 4294967168 }
 0x1da   :  { %215 = vsyncpa [#allocation3], 1 }

</bundles_post_ra>
